<compile_context>
chip_gen: v7x
topology: tpu7x:2x2x1
jax: 0.10.0
libtpu: 0.0.40
codegen_flags: <defaults>
</compile_context>

<pallas_src>
import functools

import jax
import jax.numpy as jnp
from jax.experimental import pallas as pl
from jax.experimental.pallas import tpu as pltpu


# ----------------------------------------------------------------------------- kernel
def _swiglu_kernel(x_ref, w1_ref, w3_ref, w2_ref, o_ref, acc_ref):
    # x_ref:   (tm, d_model)
    # w1_ref:  (d_model, tn)      gate projection tile
    # w3_ref:  (d_model, tn)      up projection tile
    # w2_ref:  (tn, d_model)      down projection tile
    # o_ref:   (tm, d_model)
    # acc_ref: (tm, d_model) f32 scratch, persists across the hidden (reduction) axis
    h = pl.program_id(1)

    @pl.when(h == 0)
    def _():
        acc_ref[...] = jnp.zeros_like(acc_ref)

    x = x_ref[...]
    # Two MXU passes for gate/up (identical FLOPs to a fused slab, no slicing copy).
    h1 = jnp.dot(x, w1_ref[...], preferred_element_type=jnp.float32)   # (tm, tn) f32
    h3 = jnp.dot(x, w3_ref[...], preferred_element_type=jnp.float32)   # (tm, tn) f32
    g = (h1 * jax.nn.sigmoid(h1)) * h3                                  # silu(h1)*h3

    # Partial down-projection, accumulated in f32 across hidden tiles.
    acc_ref[...] += jnp.dot(g.astype(w2_ref.dtype), w2_ref[...],
                            preferred_element_type=jnp.float32)

    @pl.when(h == pl.num_programs(1) - 1)
    def _():
        o_ref[...] = acc_ref[...].astype(o_ref.dtype)
    # TODO(synk): dropout omitted — forward is identity in eval mode; training-mode
    # dropout would need pltpu.prng_seed / pltpu.prng_random_bits masking here.


# ------------------------------------------------------------------------ tile picking
def _vmem_capacity_bytes():
    """Per-core VMEM capacity; conservative 64 MiB (v7x) fallback if query fails."""
    try:
        cap = getattr(pltpu.get_tpu_info(), "vmem_capacity_bytes", None)
        if cap:
            return int(cap)
    except Exception:
        pass
    return 64 << 20


def _device_kind():
    try:
        return jax.devices()[0].device_kind.lower()
    except Exception:
        return ""


def _footprint_bytes(tm, tn, d_model, x_itemsize, w_itemsize):
    """Double-buffered block footprint + f32 accumulator."""
    return (2 * (tm * d_model * x_itemsize          # x blocks
                 + 2 * d_model * tn * w_itemsize    # w1 + w3 blocks
                 + tn * d_model * w_itemsize        # w2 blocks
                 + tm * d_model * x_itemsize)       # out blocks
            + tm * d_model * 4)                     # f32 accumulator scratch


def _pick_hidden_tile(hidden, tn_target):
    """Largest divisor of `hidden` that is a multiple of 128 and <= tn_target."""
    if hidden <= tn_target:
        return hidden
    best = None
    d = 128
    while d <= tn_target:
        if hidden % d == 0:
            best = d
        d += 128
    # No 128-multiple divisor <= target (rare, e.g. hidden not a multiple of 128):
    # fall back to the full hidden dim (single reduction step).
    return best if best is not None else hidden


def _pick_row_tile(d_model, tn, x_itemsize, w_itemsize, vmem_cap):
    """Largest tm from a ladder whose footprint fits ~70% of VMEM.

    Larger tm => arithmetic intensity ~ 2*tm/w_itemsize flop/B on the weight
    stream and fewer weight re-fetches (weights are re-read M/tm times).
    """
    budget = int(vmem_cap * 0.70)
    for tm in (1024, 768, 512, 384, 256, 128, 64, 32, 16, 8):
        if _footprint_bytes(tm, tn, d_model, x_itemsize, w_itemsize) <= budget:
            return tm
    return 8


# -------------------------------------------------------------------------- entry point
def swiglu_pallas(x, w1, w3, w2, *, tm=None, tn=None, vmem_limit_bytes=None):
    """x: (M, d_model); w1, w3: (d_model, hidden); w2: (hidden, d_model).

    Weights are stored transposed w.r.t. PyTorch nn.Linear (y = x @ W).
    """
    M, d_model = x.shape
    hidden = w1.shape[1]
    ix = x.dtype.itemsize
    iw = w1.dtype.itemsize

    vmem_cap = _vmem_capacity_bytes()

    # --- Hidden tiling (reduction axis): divisor search keeps blocks bounded. ---
    tn_target = 512 if tn is None else tn
    if tn is None or hidden % tn != 0 or not (tn == hidden or tn % 128 == 0):
        tn = _pick_hidden_tile(hidden, tn_target)
    n_h = hidden // tn

    # --- Row tiling: generation-aware tm; never tile past M for tiny inputs. ---
    if tm is None:
        tm = _pick_row_tile(d_model, tn, ix, iw, vmem_cap)
    if M <= tm:
        tm = M
        m_pad = M
    else:
        m_pad = pl.cdiv(M, tm) * tm

    grid_m = m_pad // tm
    # v7x has 2 TensorCores: make the "parallel" row-grid extent even so both
    # cores get equal work (no-op / skipped on single-core v5e/v6e).
    if "v7" in _device_kind() and grid_m > 1 and grid_m % 2 == 1:
        grid_m += 1
        m_pad = grid_m * tm

    x_in = jnp.pad(x, ((0, m_pad - M), (0, 0))) if m_pad != M else x
    grid = (grid_m, n_h)

    # --- VMEM scoped limit: actual footprint + margin, capped at 85% of chip VMEM. ---
    est_vmem = _footprint_bytes(tm, tn, d_model, ix, iw)
    if vmem_limit_bytes is None:
        vmem_limit_bytes = min(max(est_vmem + (4 << 20), 32 << 20),
                               int(vmem_cap * 0.85))

    # Weights are re-streamed once per row tile.
    weight_bytes = (w1.size + w3.size + w2.size) * iw * grid_m
    cost = pl.CostEstimate(
        flops=6 * m_pad * d_model * hidden,           # 2*M*d*h for each of w1, w3, w2
        transcendentals=m_pad * hidden,               # sigmoid
        bytes_accessed=(x_in.size * ix + weight_bytes + m_pad * d_model * ix),
    )

    out = pl.pallas_call(
        _swiglu_kernel,
        out_shape=jax.ShapeDtypeStruct((m_pad, d_model), x.dtype),
        grid_spec=pltpu.PrefetchScalarGridSpec(
            num_scalar_prefetch=0,
            grid=grid,
            in_specs=[
                pl.BlockSpec((tm, d_model), lambda i, h: (i, 0)),   # x row-tile (resident over h)
                pl.BlockSpec((d_model, tn), lambda i, h: (0, h)),   # w1 hidden-tile
                pl.BlockSpec((d_model, tn), lambda i, h: (0, h)),   # w3 hidden-tile
                pl.BlockSpec((tn, d_model), lambda i, h: (h, 0)),   # w2 hidden-tile
            ],
            out_specs=pl.BlockSpec((tm, d_model), lambda i, h: (i, 0)),
            scratch_shapes=[pltpu.VMEM((tm, d_model), jnp.float32)],
        ),
        compiler_params=pltpu.CompilerParams(
            dimension_semantics=("parallel", "arbitrary"),
            vmem_limit_bytes=int(vmem_limit_bytes),
        ),
        cost_estimate=cost,
    )(x_in, w1, w3, w2)

    return out[:M] if m_pad != M else out


def swiglu_reference(x, w1, w3, w2):
    h1 = x @ w1
    h3 = x @ w3
    return (jax.nn.silu(h1) * h3) @ w2


# --------------------------------------------------------------------------------- test
if __name__ == "__main__":
    key = jax.random.PRNGKey(0)

    # --- Case 1: shapes implied by the module (single-tile path). ---
    batch, seq, d_model, hidden = 2, 8, 32, 64
    kx, k1, k2, k3 = jax.random.split(key, 4)
    x = jax.random.normal(kx, (batch, seq, d_model), dtype=jnp.float32)
    s1 = 1.0 / jnp.sqrt(d_model)
    s2 = 1.0 / jnp.sqrt(hidden)
    w1 = jax.random.normal(k1, (d_model, hidden), dtype=jnp.float32) * s1
    w3 = jax.random.normal(k3, (d_model, hidden), dtype=jnp.float32) * s1
    w2 = jax.random.normal(k2, (hidden, d_model), dtype=jnp.float32) * s2

    x2d = x.reshape(batch * seq, d_model)
    out = swiglu_pallas(x2d, w1, w3, w2).reshape(batch, seq, d_model)
    jax.block_until_ready(out)
    ref = swiglu_reference(x2d, w1, w3, w2).reshape(batch, seq, d_model)
    assert jnp.allclose(out, ref, atol=1e-4, rtol=1e-4), "case-1 mismatch vs reference"

    # --- Case 2: exercise the tiled reduction/accumulator path (grid = (2, 2)). ---
    d_model2, hidden2 = 32, 256
    kx2, k1b, k2b, k3b = jax.random.split(jax.random.PRNGKey(0), 4)
    x2 = jax.random.normal(kx2, (batch * seq, d_model2), dtype=jnp.float32)
    w1b = jax.random.normal(k1b, (d_model2, hidden2), dtype=jnp.float32) / jnp.sqrt(d_model2)
    w3b = jax.random.normal(k3b, (d_model2, hidden2), dtype=jnp.float32) / jnp.sqrt(d_model2)
    w2b = jax.random.normal(k2b, (hidden2, d_model2), dtype=jnp.float32) / jnp.sqrt(hidden2)
    out2 = swiglu_pallas(x2, w1b, w3b, w2b, tm=8, tn=128)
    jax.block_until_ready(out2)
    ref2 = swiglu_reference(x2, w1b, w3b, w2b)
    assert jnp.allclose(out2, ref2, atol=1e-4, rtol=1e-4), "case-2 mismatch vs reference"

    print("KERNEL_OK")
</pallas_src>

<mosaic_0001>
module attributes {stable_mosaic.version = 11 : i64} {
  func.func @_swiglu_kernel(%arg0: i32, %arg1: i32, %arg2: memref<16x32xf32, #tpu.memory_space<vmem>>, %arg3: memref<32x64xf32, #tpu.memory_space<vmem>>, %arg4: memref<32x64xf32, #tpu.memory_space<vmem>>, %arg5: memref<64x32xf32, #tpu.memory_space<vmem>>, %arg6: memref<16x32xf32, #tpu.memory_space<vmem>>, %arg7: memref<16x32xf32, #tpu.memory_space<vmem>>) attributes {dimension_semantics = [#tpu.dimension_semantics<parallel>, #tpu.dimension_semantics<arbitrary>], iteration_bounds = array<i64: 1, 1>, scalar_prefetch = 0 : i64, scratch_operands = 1 : i64, tpu.core_type = #tpu.core_type<tc>, window_params = [{transform_indices = @transform_0, window_bounds = array<i64: 16, 32>}, {transform_indices = @transform_1, window_bounds = array<i64: 32, 64>}, {transform_indices = @transform_2, window_bounds = array<i64: 32, 64>}, {transform_indices = @transform_3, window_bounds = array<i64: 64, 32>}, {transform_indices = @transform_4, window_bounds = array<i64: 16, 32>}]} {
    %c0_i32 = arith.constant 0 : i32
    %0 = arith.cmpi eq, %arg1, %c0_i32 : i32
    %1 = arith.extui %0 : i1 to i32
    %c0_i32_0 = arith.constant 0 : i32
    %2 = arith.cmpi ne, %1, %c0_i32_0 : i32
    scf.if %2 {
      %cst_17 = arith.constant 0.000000e+00 : f32
      %23 = vector.broadcast %cst_17 : f32 to vector<16x32xf32>
      %c0_18 = arith.constant 0 : index
      %c0_19 = arith.constant 0 : index
      %24 = vector.load %arg7[%c0_18, %c0_19] : memref<16x32xf32, #tpu.memory_space<vmem>>, vector<16x32xf32>
      tpu.vector_store %arg7[%c0_18, %c0_19], %23 {strides = array<i32>} : memref<16x32xf32, #tpu.memory_space<vmem>>, vector<16x32xf32>,
    } else {
    }
    %c0 = arith.constant 0 : index
    %c0_1 = arith.constant 0 : index
    %3 = vector.load %arg2[%c0, %c0_1] : memref<16x32xf32, #tpu.memory_space<vmem>>, vector<16x32xf32>
    %c0_2 = arith.constant 0 : index
    %c0_3 = arith.constant 0 : index
    %4 = vector.load %arg3[%c0_2, %c0_3] : memref<32x64xf32, #tpu.memory_space<vmem>>, vector<32x64xf32>
    %cst = arith.constant dense<0.000000e+00> : vector<16x64xf32>
    %5 = tpu.matmul %3, %4, %cst {dimension_numbers = #tpu.dot_dimension_numbers<[1], [0], [0], [1], [0, 0, 1, 1], [], []>} : vector<16x32xf32>, vector<32x64xf32>, vector<16x64xf32> -> vector<16x64xf32>
    %c0_4 = arith.constant 0 : index
    %c0_5 = arith.constant 0 : index
    %6 = vector.load %arg4[%c0_4, %c0_5] : memref<32x64xf32, #tpu.memory_space<vmem>>, vector<32x64xf32>
    %cst_6 = arith.constant dense<0.000000e+00> : vector<16x64xf32>
    %7 = tpu.matmul %3, %6, %cst_6 {dimension_numbers = #tpu.dot_dimension_numbers<[1], [0], [0], [1], [0, 0, 1, 1], [], []>} : vector<16x32xf32>, vector<32x64xf32>, vector<16x64xf32> -> vector<16x64xf32>
    %8 = arith.negf %5 : vector<16x64xf32>
    %9 = math.exp %8 : vector<16x64xf32>
    %cst_7 = arith.constant 1.000000e+00 : f32
    %10 = vector.broadcast %cst_7 : f32 to vector<16x64xf32>
    %11 = arith.addf %10, %9 : vector<16x64xf32>
    %12 = arith.divf %10, %11 : vector<16x64xf32>
    %13 = arith.mulf %5, %12 : vector<16x64xf32>
    %14 = arith.mulf %13, %7 : vector<16x64xf32>
    %c0_8 = arith.constant 0 : index
    %c0_9 = arith.constant 0 : index
    %15 = vector.load %arg7[%c0_8, %c0_9] : memref<16x32xf32, #tpu.memory_space<vmem>>, vector<16x32xf32>
    %c0_10 = arith.constant 0 : index
    %c0_11 = arith.constant 0 : index
    %16 = vector.load %arg5[%c0_10, %c0_11] : memref<64x32xf32, #tpu.memory_space<vmem>>, vector<64x32xf32>
    %cst_12 = arith.constant dense<0.000000e+00> : vector<16x32xf32>
    %17 = tpu.matmul %14, %16, %cst_12 {dimension_numbers = #tpu.dot_dimension_numbers<[1], [0], [0], [1], [0, 0, 1, 1], [], []>} : vector<16x64xf32>, vector<64x32xf32>, vector<16x32xf32> -> vector<16x32xf32>
    %18 = arith.addf %15, %17 : vector<16x32xf32>
    %c0_13 = arith.constant 0 : index
    %c0_14 = arith.constant 0 : index
    %19 = vector.load %arg7[%c0_13, %c0_14] : memref<16x32xf32, #tpu.memory_space<vmem>>, vector<16x32xf32>
    tpu.vector_store %arg7[%c0_13, %c0_14], %18 {strides = array<i32>} : memref<16x32xf32, #tpu.memory_space<vmem>>, vector<16x32xf32>,
    %c0_i32_15 = arith.constant 0 : i32
    %20 = arith.cmpi eq, %arg1, %c0_i32_15 : i32
    %21 = arith.extui %20 : i1 to i32
    %c0_i32_16 = arith.constant 0 : i32
    %22 = arith.cmpi ne, %21, %c0_i32_16 : i32
    scf.if %22 {
      %c0_17 = arith.constant 0 : index
      %c0_18 = arith.constant 0 : index
      %23 = vector.load %arg7[%c0_17, %c0_18] : memref<16x32xf32, #tpu.memory_space<vmem>>, vector<16x32xf32>
      %c0_19 = arith.constant 0 : index
      %c0_20 = arith.constant 0 : index
      %24 = vector.load %arg6[%c0_19, %c0_20] : memref<16x32xf32, #tpu.memory_space<vmem>>, vector<16x32xf32>
      tpu.vector_store %arg6[%c0_19, %c0_20], %23 {strides = array<i32>} : memref<16x32xf32, #tpu.memory_space<vmem>>, vector<16x32xf32>,
    } else {
    }
    return
  }
  func.func @transform_0(%arg0: i32, %arg1: i32) -> (i32, i32) {
    %c0_i32 = arith.constant 0 : i32
    %c0_i32_0 = arith.constant 0 : i32
    return %arg0, %c0_i32 : i32, i32
  }
  func.func @transform_1(%arg0: i32, %arg1: i32) -> (i32, i32) {
    %c0_i32 = arith.constant 0 : i32
    %c0_i32_0 = arith.constant 0 : i32
    return %c0_i32, %arg1 : i32, i32
  }
  func.func @transform_2(%arg0: i32, %arg1: i32) -> (i32, i32) {
    %c0_i32 = arith.constant 0 : i32
    %c0_i32_0 = arith.constant 0 : i32
    return %c0_i32, %arg1 : i32, i32
  }
  func.func @transform_3(%arg0: i32, %arg1: i32) -> (i32, i32) {
    %c0_i32 = arith.constant 0 : i32
    %c0_i32_0 = arith.constant 0 : i32
    return %arg1, %c0_i32 : i32, i32
  }
  func.func @transform_4(%arg0: i32, %arg1: i32) -> (i32, i32) {
    %c0_i32 = arith.constant 0 : i32
    %c0_i32_0 = arith.constant 0 : i32
    return %arg0, %c0_i32 : i32, i32
  }
}

</mosaic_0001>

<bundles_post_ra>
// kernel: tpu_custom_call.1
= control target key start
LH: loop header
LB: loop body
LE: loop exit
PB: predicated region body
PF: predicated region fallthrough
CT: control target
= control target key end

     0   :  { %vm22_vm0 = vcmask 261120   ;;  %s571_s0 = inlined_call_operand.vmem [shape: f32[16,32], index: 0, kind: input, shape index: {}]   ;;  %s572_s1 = inlined_call_operand.vmem [shape: f32[32,64], index: 1, kind: input, shape index: {}]   ;;  %s573_s2 = inlined_call_operand.vmem [shape: f32[32,64], index: 2, kind: input, shape index: {}]   ;;  %s574_s3 = inlined_call_operand.vmem [shape: f32[64,32], index: 3, kind: input, shape index: {}]   ;;  %s575_s4 = inlined_call_operand.hbm [shape: f32[16,32], index: 4, kind: output, shape index: {}]  }
   0x1   :  { %v27_v0 = vld [vmem:[%s572_s1] sm:$0xff]  ;;  %v28_v1 = vld [vmem:[%s572_s1 + $0x8] sm:$0xff]  ;;  %v29_v2 = vld [vmem:[%s572_s1 + $0x10] sm:$0xff] }
   0x2   :  { %v398_v3 = vpack.c.bf16 %v28_v1, %v27_v0  ;;  %v30_v4 = vld [vmem:[%s572_s1 + $0x18] sm:$0xff]  ;;  %v25_v5 = vld [vmem:[%s571_s0] sm:$0xff]  ;;  %v114_v8 = vld [vmem:[%s573_s2 + $0x8] sm:$0xff] }
   0x3   :  { %v402_v6 = vpack.c.bf16 %v30_v4, %v29_v2  ;;  %365 = vmatprep.mubr.msk.f32.mxu1 %vm22_vm0, %v25_v5  ;;  %v113_v7 = vld [vmem:[%s573_s2] sm:$0xff] }
   0x4   :  { %399 = vmatprep.subr.bf16.mxu1 %v398_v3 }
   0x5   :  { %9 = vsyncpa [#allocation4], 0  ;;  %401 = vmatpush3.bf16.msra.mxu1 %v398_v3  ;;  %v406_v9 = vpack.c.bf16 %v114_v8, %v113_v7  ;;  %v115_v10 = vld [vmem:[%s573_s2 + $0x10] sm:$0xff]  ;;  %v116_v11 = vld [vmem:[%s573_s2 + $0x18] sm:$0xff]  ;;  %v466_v26 = vmov 0.0   ;;  %vm218_vm1 = vcmask 523264  }
   0x6   :  { %403 = vmatprep.subr.bf16.mxu1 %v402_v6  ;;  %v26_v12 = vld [vmem:[%s571_s0 + $0x8] sm:$0xff]  ;;  %v410_v13 = vpack.c.bf16 %v116_v11, %v115_v10  ;;  %v210_v14 = vld [vmem:[%s574_s3] sm:$0xff]  ;;  %v212_v17 = vld [vmem:[%s574_s3 + $0x10] sm:$0xff]  ;;  %24 = vst.msk [vmem:[#allocation2 + $0x8] sm:$0xff] %vm22_vm0, %v466_v26 }
   0x7   :  { %v211_v15 = vld [vmem:[%s574_s3 + $0x8] sm:$0xff]  ;;  %v213_v18 = vld [vmem:[%s574_s3 + $0x18] sm:$0xff]  ;;  %v214_v20 = vld [vmem:[%s574_s3 + $0x20] sm:$0xff]  ;;  %23 = vst.msk [vmem:[#allocation2] sm:$0xff] %vm22_vm0, %v466_v26 }
   0x8   :  { %v414_v16 = vpack.c.bf16 %v211_v15, %v210_v14  ;;  %v418_v19 = vpack.c.bf16 %v213_v18, %v212_v17  ;;  %v215_v21 = vld [vmem:[%s574_s3 + $0x28] sm:$0xff]  ;;  %v216_v23 = vld [vmem:[%s574_s3 + $0x30] sm:$0xff]  ;;  %v217_v24 = vld [vmem:[%s574_s3 + $0x38] sm:$0xff]  ;;  %s467_s3 = smov [#allocation3]  }
   0x9   :  { %405 = vmatpush3.bf16.msra.mxu1 %v402_v6  ;;  %v422_v22 = vpack.c.bf16 %v215_v21, %v214_v20  ;;  %v426_v25 = vpack.c.bf16 %v217_v24, %v216_v23  ;;  %s316_s22 = sshll.u32 %s467_s3, 4  ;;  %s317_s22 = int_to_ptr.vmem [resolvable:$true] %s316_s22 }
   0xa   :  { %407 = vmatprep.subr.bf16.mxu1 %v406_v9  ;;  %415 = vmatprep.subr.bf16.mxu0 %v414_v16  ;;  %s442_s23 = scalar_lea.vmem %s317_s22, 256  ;;  %p447_p1 = scmp.lt.s32.totalorder %s317_s22, %s317_s22 }
   0xb   :  { %417 = vmatpush3.bf16.msra.mxu0 %v414_v16  ;;  %p443_p0 = scmp.ne.s32.totalorder %s317_s22, %s442_s23  ;;  %p448_p2 = scmp.lt.s32.totalorder %s442_s23, %s442_s23 }
   0xc   :  { %366 = vmatmul.mubr.msk.f32.vlgmr.msra.gmra.mrb[0].mxu1 %vm22_vm0, %v26_v12  ;;  %419 = vmatprep.subr.bf16.mxu0 %v418_v19 }
   0xd   :  { %409 = vmatpush3.bf16.msra.mxu1 %v406_v9  ;;  %376 = vmatprep.mubr.msk.f32.mxu1 %vm22_vm0, %v25_v5  ;;  %v209_v43 = vld [vmem:[#allocation2 + $0x8] sm:$0xff]  ;;  %p449_p3 = por %p448_p2, %p447_p1 }
   0xe   :  { %411 = vmatprep.subr.bf16.mxu1 %v410_v13  ;;  %v208_v44 = vld [vmem:[#allocation2] sm:$0xff] }
   0xf   :  { %421 = vmatpush3.bf16.msra.mxu0 %v418_v19  ;;  %p450_p4 = pnand %p449_p3, %p443_p0 }
  0x10   :  { %423 = vmatprep.subr.bf16.mxu0 %v422_v22 }
  0x11   :  { %413 = vmatpush3.bf16.msra.mxu1 %v410_v13 }
  0x13   :  { %425 = vmatpush3.bf16.msra.mxu0 %v422_v22 }
  0x14   :  { %377 = vmatmul.mubr.msk.f32.vlgmr.msra.gmra.mrb[2].mxu1 %vm22_vm0, %v26_v12  ;;  %427 = vmatprep.subr.bf16.mxu0 %v426_v25 }
  0x17   :  { %429 = vmatpush3.bf16.msra.mxu0 %v426_v25 }
  0xdf   :  { %v367_v27 = vpop.f32.mrb[0].mxu1 }
  0xe0   :  { %v332_v28 = vmul.f32 -1.442695, %v367_v27  ;;  %v104_v29 = vpop.f32.mrb[1].mxu1 }
  0xe1   :  { %v331_v30 = vmul.f32 -1.442695, %v104_v29 }
  0xe2   :  { %434 = vpow2.f32 %v332_v28 }
  0xe3   :  { %436 = vpow2.f32 %v331_v30 }
  0xe7   :  { %v378_v31 = vpop.f32.mrb[2].mxu1 }
  0xe8   :  { %v183_v32 = vpop.f32.mrb[3].mxu1 }
  0xec   :  { %v435_v33 = vpop.eup %434 }
  0xed   :  { %v437_v34 = vpop.eup %436  ;;  %v199_v35 = vadd.f32 1.0, %v435_v33 }
  0xee   :  { %v198_v36 = vadd.f32 1.0, %v437_v34 }
  0xef   :  { %438 = vrcp.f32 %v199_v35 }
  0xf0   :  { %440 = vrcp.f32 %v198_v36 }
  0xf9   :  { %v439_v37 = vpop.eup %438 }
  0xfa   :  { %v441_v38 = vpop.eup %440  ;;  %v205_v39 = vmul.f32 %v439_v37, %v367_v27 }
  0xfb   :  { %v204_v40 = vmul.f32 %v441_v38, %v104_v29 }
  0xfc   :  { %v207_v41 = vmul.f32 %v378_v31, %v205_v39 }
  0xfd   :  { %v206_v42 = vmul.f32 %v204_v40, %v183_v32 }
  0xff   :  { %395 = vmatprep.mubr.msk.f32.mxu0 %vm218_vm1, %v206_v42 }
 0x100   :  { %396 = vmatmul.mubr.msk.f32.vlgmr.msra.gmra.mrb[0].mxu0 %vm218_vm1, %v207_v41 }
 0x1d3   :  { %v397_v45 = vpop.f32.mrb[0].mxu0 }
 0x1d4   :  { %v301_v46 = vadd.f32 %v397_v45, %v209_v43  ;;  %v291_v47 = vpop.f32.mrb[1].mxu0 }
 0x1d5   :  { %v300_v48 = vadd.f32 %v291_v47, %v208_v44 }
 0x1d6   :  { %303 = vst.msk [vmem:[#allocation2 + $0x8] sm:$0xff] %vm22_vm0, %v301_v46 }
 0x1d7   :  { %302 = vst.msk [vmem:[#allocation2] sm:$0xff] %vm22_vm0, %v300_v48 }
 0x1dd   :  { %v308_v49 = vld [vmem:[#allocation2 + $0x8] sm:$0xff] }
 0x1de   :  { %v307_v50 = vld [vmem:[#allocation2] sm:$0xff]  ;;  %310 = vst.msk [vmem:[#allocation3 + $0x8] sm:$0xff] %vm22_vm0, %v308_v49 }
 0x1df   :  { %309 = vst.msk [vmem:[#allocation3] sm:$0xff] %vm22_vm0, %v307_v50 }
 0x1e0   :  { %453 = shalt.err (!%p450_p4)
}
 0x1e1   :  { %s454_s26 = scalar_lea.hbm %s575_s4, 256 }
 0x1e2   :  { %p455_p5 = scmp.ne.s32.totalorder %s575_s4, %s454_s26  ;;  %p458_p6 = scmp.lt.u32.totalorder %s454_s26, %s575_s4 }
 0x1e4   :  { %p460_p7 = pnand %p458_p6, %p455_p5 }
 0x1e6   :  { %463 = shalt.err (!%p460_p7)
}
 0x1e7   :  { %s468_s30 = smov 128   ;;  %s469_s5 = smov 8  }
 0x1e8   :  { %322 = dma.vmem_to_hbm [thread:$0]  %s317_s22, 256, %s575_s4, [#allocation4], %s468_s30, %s468_s30, %s469_s5  }
 0x1e9   :  { %464 = dma.done.wait [#allocation4], 256  }
 0x1ea   :  { %465 = vsyncadd [#allocation4], 4294967040 }
 0x1eb   :  { %326 = vsyncpa [#allocation4], 1 }

</bundles_post_ra>
